<compile_context>
chip_gen: v7x
topology: tpu7x:2x2x1
jax: 0.10.0
libtpu: 0.0.40
codegen_flags: <defaults>
</compile_context>

<pallas_src>
import functools
import math

import jax
import jax.numpy as jnp
from jax import lax
from jax.experimental import pallas as pl
from jax.experimental.pallas import tpu as pltpu


# -----------------------------------------------------------------------------
# Plain-JAX glue: sparse soft top-k mask via Dykstra (capped-simplex projection)
# (external helper in the original repo; canonical re-implementation)
# -----------------------------------------------------------------------------
def _proj_pair_chain(v, start):
    """Project v onto {v[start] >= v[start+1], v[start+2] >= v[start+3], ...}."""
    a = v[start::2]
    b = v[start + 1::2]
    m = min(a.shape[0], b.shape[0])
    a_, b_ = a[:m], b[:m]
    avg = 0.5 * (a_ + b_)
    viol = a_ < b_
    v = v.at[start:start + 2 * m:2].set(jnp.where(viol, avg, a_))
    v = v.at[start + 1:start + 2 * m:2].set(jnp.where(viol, avg, b_))
    return v


def _isotonic_dykstra_nonincreasing(s, num_iter):
    """argmin_v 0.5||v - s||^2  s.t. v_1 >= v_2 >= ... >= v_n  (Dykstra)."""
    def body(carry, _):
        x, p, q = carry
        y = _proj_pair_chain(x + p, 0)
        p = x + p - y
        x_new = _proj_pair_chain(y + q, 1)
        q = y + q - x_new
        return (x_new, p, q), None

    (x, _, _), _ = lax.scan(
        body, (s, jnp.zeros_like(s), jnp.zeros_like(s)), None, length=num_iter)
    return x


def sparse_soft_topk_mask_dykstra(x, k, l=1e-2, num_iter=50):
    """Relaxed top-k mask: projection of x/l onto {0<=m<=1, sum(m)=k}."""
    n = x.shape[0]
    perm = jnp.argsort(-x)
    s = x[perm] / l
    w = (jnp.arange(n) < k).astype(x.dtype)
    v = _isotonic_dykstra_nonincreasing(s - w, num_iter)
    out_sorted = jnp.clip(s - v, 0.0, 1.0)
    inv = jnp.argsort(perm)
    return out_sorted[inv]


# -----------------------------------------------------------------------------
# Wrapper-side weight assembly (plain JAX, runs once per forward)
# -----------------------------------------------------------------------------
def _assemble_transposed_weight(V, alpha_topk, in_features, out_features,
                                dtype=jnp.bfloat16):
    """Build M = W.T with shape (in_features, out_features), cast to `dtype`.

    M_pd[r, c] = alpha_topk[(r - c) % P] * V[(r - c) % P, c]   (P = max, D = min)
    W = M_pd if out >= in else M_pd.T   =>   M = W.T.
    """
    P = max(in_features, out_features)
    D = min(in_features, out_features)
    A = (alpha_topk[:, None] * V).astype(jnp.float32)              # (P, D)
    r = jnp.arange(P)[:, None]
    c = jnp.arange(D)[None, :]
    i_idx = (r - c) % P
    M_pd = A[i_idx, jnp.broadcast_to(c, (P, D))]                    # (P, D)
    M = M_pd.T if out_features >= in_features else M_pd             # (in, out)
    return M.astype(dtype)


# -----------------------------------------------------------------------------
# Pallas kernel: out_tile = x_tile @ M_tile  (bf16 operands, f32 accumulation)
# -----------------------------------------------------------------------------
def _fc_kernel(m_ref, x_ref, o_ref):
    """
    m_ref: (in, block_out) bf16  -- pre-assembled W.T tile (resident; constant
                                    block index along the batch grid axis).
    x_ref: (block_batch, in) x.dtype -- batch tile.
    o_ref: (block_batch, block_out)  -- output tile (lane-dense along out).
    """
    o_ref[...] = lax.dot_general(
        x_ref[...].astype(jnp.bfloat16), m_ref[...],
        dimension_numbers=(((1,), (0,)), ((), ())),
        preferred_element_type=jnp.float32,
    ).astype(o_ref.dtype)


def _vmem_limit_bytes(bytes_needed):
    """Generation-aware VMEM limit with headroom below physical capacity."""
    try:
        cap = pltpu.get_tpu_info().vmem_capacity_bytes   # 128 MiB v5e/v6e, 64 MiB v7x
    except Exception:
        cap = 64 * 2**20                                 # conservative fallback
    headroom = 16 * 2**20
    hi = max(cap - headroom, 32 * 2**20)
    return int(min(hi, max(32 * 2**20, 2 * bytes_needed)))


def custom_fc_forward(x, V, alpha, *, in_features, out_features, K,
                      alpha_lr=0.01, block_batch=None, block_out=None):
    P = max(in_features, out_features)
    D = min(in_features, out_features)
    assert V.shape == (P, D) and alpha.shape == (P,)
    assert x.shape[-1] == in_features

    # Parameter post-processing (plain JAX): soft top-k, fold alpha into V,
    # assemble the full wrapped-diagonal weight once, already transposed + bf16.
    alpha_topk = sparse_soft_topk_mask_dykstra(alpha, K, l=alpha_lr, num_iter=50)
    M = _assemble_transposed_weight(V, alpha_topk, in_features, out_features)

    # Flatten arbitrary leading dims (F.linear semantics).
    lead = x.shape[:-1]
    x2 = x.reshape(-1, in_features)
    B = x2.shape[0]

    # Batch tile: >=512 rows (multiple of the MXU M dim) when batch is large.
    if block_batch is None:
        block_batch = B if B <= 512 else 512
    block_batch = min(block_batch, B)

    # out_features tile: full width unless the bf16 weight slab is large
    # (keeps the resident weight tile bounded on v7x's 64 MiB VMEM).
    if block_out is None:
        weight_bytes = in_features * out_features * 2
        if out_features <= 512 or weight_bytes <= 8 * 2**20:
            block_out = out_features
        else:
            tgt = max(256, ((8 * 2**20) // (in_features * 2)) // 256 * 256)
            block_out = min(out_features, tgt)
    block_out = min(block_out, out_features)

    grid = (pl.cdiv(B, block_batch), pl.cdiv(out_features, block_out))

    x_bytes = x2.dtype.itemsize
    bytes_needed = (
        2 * in_features * block_out * 2          # bf16 weight tile (double-buffered)
        + 2 * block_batch * in_features * x_bytes  # x tile, double-buffered
        + 2 * block_batch * block_out * x_bytes    # out tile, double-buffered
    )
    vmem_limit = _vmem_limit_bytes(bytes_needed)

    # NOTE: if profiling shows exposed x DMA at large block_batch, deepen the x
    # pipeline with pipeline_mode=pl.Buffered(3) on in_specs[1].
    out2 = pl.pallas_call(
        _fc_kernel,
        out_shape=jax.ShapeDtypeStruct((B, out_features), x.dtype),
        grid=grid,
        in_specs=[
            # Pre-assembled bf16 weight: constant along the batch axis, tiled
            # (if needed) along out_features.
            pl.BlockSpec((in_features, block_out), lambda b, o: (0, o)),
            pl.BlockSpec((block_batch, in_features), lambda b, o: (b, 0)),
        ],
        out_specs=pl.BlockSpec((block_batch, block_out), lambda b, o: (b, o)),
        compiler_params=pltpu.CompilerParams(
            # No accumulation across either grid axis -> both truly parallel
            # (lets v7x's two TensorCores split the batch tiles).
            dimension_semantics=("parallel", "parallel"),
            vmem_limit_bytes=vmem_limit,
        ),
    )(M, x2)
    return out2.reshape(*lead, out_features)


# -----------------------------------------------------------------------------
# Pure-JAX references (for verification)
# -----------------------------------------------------------------------------
def reference_weight(V, alpha_topk, in_features, out_features):
    P = max(in_features, out_features)
    D = min(in_features, out_features)
    r = jnp.arange(P)[:, None]
    c = jnp.arange(D)[None, :]
    i_idx = (r - c) % P
    M = alpha_topk[i_idx] * V[i_idx, jnp.broadcast_to(c, (P, D))]
    return M if out_features >= in_features else M.T       # W, shape (out, in)


if __name__ == "__main__":
    alpha_lr = 0.01
    sparsity = 0.1
    batch = 32

    key = jax.random.PRNGKey(0)
    # Test both orientations: out >= in and out < in.  The second case uses a
    # small block_batch purely to exercise the multi-step batch grid in the
    # test; the production default is >=512-row tiles.
    for (in_f, out_f), bb in [((64, 128), None), ((128, 64), 16)]:
        key, k_v, k_x = jax.random.split(key, 3)

        P = max(in_f, out_f)
        D = min(in_f, out_f)
        num_params = in_f * out_f
        req_params = int((1 - sparsity) * num_params)
        K = math.ceil(req_params / D)

        # V ~ kaiming_uniform_(a=sqrt(5)) on (P, D): bound = 1/sqrt(fan_in), fan_in = D.
        bound = 1.0 / math.sqrt(D)
        V = jax.random.uniform(k_v, (P, D), dtype=jnp.float32,
                               minval=-bound, maxval=bound)
        # alpha = constant 1/in_features
        alpha = jnp.full((P,), 1.0 / in_f, dtype=jnp.float32)

        x = jax.random.normal(k_x, (batch, in_f), dtype=jnp.float32)

        out = custom_fc_forward(x, V, alpha, in_features=in_f, out_features=out_f,
                                K=K, alpha_lr=alpha_lr, block_batch=bb)
        out = jax.block_until_ready(out)
        assert out.shape == (batch, out_f)

        # References.
        alpha_topk = sparse_soft_topk_mask_dykstra(alpha, K, l=alpha_lr, num_iter=50)
        W = reference_weight(V, alpha_topk, in_f, out_f)            # (out, in), f32
        ref_f32 = x @ W.T
        ref_bf16 = lax.dot_general(                                  # same bf16 feed
            x.astype(jnp.bfloat16), W.T.astype(jnp.bfloat16),
            dimension_numbers=(((1,), (0,)), ((), ())),
            preferred_element_type=jnp.float32)

        assert jnp.allclose(out, ref_bf16, atol=2e-3, rtol=2e-3), \
            f"mismatch vs bf16 reference for ({in_f},{out_f})"
        assert jnp.allclose(out, ref_f32, atol=3e-2, rtol=3e-2), \
            f"mismatch vs f32 reference for ({in_f},{out_f})"

    print("KERNEL_OK")
</pallas_src>

<mosaic_0001>
module attributes {stable_mosaic.version = 11 : i64} {
  func.func @_fc_kernel(%arg0: i32, %arg1: i32, %arg2: memref<64x128xbf16, #tpu.memory_space<vmem>>, %arg3: memref<32x64xf32, #tpu.memory_space<vmem>>, %arg4: memref<32x128xf32, #tpu.memory_space<vmem>>) attributes {dimension_semantics = [#tpu.dimension_semantics<parallel>, #tpu.dimension_semantics<parallel>], iteration_bounds = array<i64: 1, 1>, scalar_prefetch = 0 : i64, scratch_operands = 0 : i64, tpu.core_type = #tpu.core_type<tc>, window_params = [{transform_indices = @transform_0, window_bounds = array<i64: 64, 128>}, {transform_indices = @transform_1, window_bounds = array<i64: 32, 64>}, {transform_indices = @transform_2, window_bounds = array<i64: 32, 128>}]} {
    %c0 = arith.constant 0 : index
    %c0_0 = arith.constant 0 : index
    %0 = vector.load %arg3[%c0, %c0_0] : memref<32x64xf32, #tpu.memory_space<vmem>>, vector<32x64xf32>
    %1 = arith.truncf %0 : vector<32x64xf32> to vector<32x64xbf16>
    %c0_1 = arith.constant 0 : index
    %c0_2 = arith.constant 0 : index
    %2 = vector.load %arg2[%c0_1, %c0_2] : memref<64x128xbf16, #tpu.memory_space<vmem>>, vector<64x128xbf16>
    %cst = arith.constant dense<0.000000e+00> : vector<32x128xf32>
    %3 = tpu.matmul %1, %2, %cst {dimension_numbers = #tpu.dot_dimension_numbers<[1], [0], [0], [1], [0, 0, 1, 1], [], []>} : vector<32x64xbf16>, vector<64x128xbf16>, vector<32x128xf32> -> vector<32x128xf32>
    %c0_3 = arith.constant 0 : index
    %c0_4 = arith.constant 0 : index
    %4 = vector.load %arg4[%c0_3, %c0_4] : memref<32x128xf32, #tpu.memory_space<vmem>>, vector<32x128xf32>
    tpu.vector_store %arg4[%c0_3, %c0_4], %3 {strides = array<i32>} : memref<32x128xf32, #tpu.memory_space<vmem>>, vector<32x128xf32>,
    return
  }
  func.func @transform_0(%arg0: i32, %arg1: i32) -> (i32, i32) {
    %c0_i32 = arith.constant 0 : i32
    %c0_i32_0 = arith.constant 0 : i32
    return %c0_i32, %arg1 : i32, i32
  }
  func.func @transform_1(%arg0: i32, %arg1: i32) -> (i32, i32) {
    %c0_i32 = arith.constant 0 : i32
    %c0_i32_0 = arith.constant 0 : i32
    return %arg0, %c0_i32 : i32, i32
  }
  func.func @transform_2(%arg0: i32, %arg1: i32) -> (i32, i32) {
    %c0_i32 = arith.constant 0 : i32
    return %arg0, %arg1 : i32, i32
  }
}

</mosaic_0001>

<bundles_post_ra>
// kernel: tpu_custom_call.1
= control target key start
LH: loop header
LB: loop body
LE: loop exit
PB: predicated region body
PF: predicated region fallthrough
CT: control target
= control target key end

     0   :  { %7 = vsyncpa [#allocation3], 0  ;;  %s328_s0 = inlined_call_operand.hbm [shape: bf16[64,128], index: 0, kind: input, shape index: {}]   ;;  %s329_s1 = inlined_call_operand.hbm [shape: f32[32,64], index: 1, kind: input, shape index: {}]   ;;  %s330_s2 = inlined_call_operand.hbm [shape: f32[32,128], index: 2, kind: output, shape index: {}]  }
   0x1   :  { %8 = vsyncpa [#allocation6], 0 }
   0x2   :  { %9 = vsyncpa [#allocation4], 0  ;;  %s264_s9 = smov [#allocation2]   ;;  %s192_s13 = scalar_lea.hbm %s328_s0, 512 }
   0x3   :  { %s15_s10 = sshll.u32 %s264_s9, 4  ;;  %p193_p0 = scmp.ne.s32.totalorder %s328_s0, %s192_s13  ;;  %s16_s10 = int_to_ptr.vmem [resolvable:$true] %s15_s10 }
   0x4   :  { %p196_p1 = scmp.lt.u32.totalorder %s192_s13, %s328_s0 }
   0x6   :  { %p198_p2 = pnand %p196_p1, %p193_p0 }
   0x8   :  { %201 = shalt.err (!%p198_p2)
}
   0x9   :  { %s202_s18 = scalar_lea.vmem %s16_s10, 512  ;;  %p207_p4 = scmp.lt.s32.totalorder %s16_s10, %s16_s10 }
   0xa   :  { %p203_p3 = scmp.ne.s32.totalorder %s16_s10, %s202_s18  ;;  %p208_p5 = scmp.lt.s32.totalorder %s202_s18, %s202_s18 }
   0xc   :  { %p209_p6 = por %p208_p5, %p207_p4 }
   0xe   :  { %p210_p7 = pnand %p209_p6, %p203_p3 }
  0x10   :  { %213 = shalt.err (!%p210_p7)
}
  0x11   :  { %s265_s19 = smov 64   ;;  %s266_s20 = smov 4  }
  0x12   :  { %21 = dma.hbm_to_vmem [thread:$0]  %s328_s0, 512, %s16_s10, [#allocation3], %s265_s19, %s265_s19, %s266_s20  }
  0x13   :  { %s267_s23 = smov [#allocation5]   ;;  %s214_s27 = scalar_lea.hbm %s329_s1, 512 }
  0x14   :  { %s27_s24 = sshll.u32 %s267_s23, 4  ;;  %p215_p8 = scmp.ne.s32.totalorder %s329_s1, %s214_s27  ;;  %s28_s24 = int_to_ptr.vmem [resolvable:$true] %s27_s24 }
  0x15   :  { %p218_p9 = scmp.lt.u32.totalorder %s214_s27, %s329_s1 }
  0x17   :  { %p220_p10 = pnand %p218_p9, %p215_p8 }
  0x19   :  { %223 = shalt.err (!%p220_p10)
}
  0x1a   :  { %s224_s4 = scalar_lea.vmem %s28_s24, 512  ;;  %p229_p12 = scmp.lt.s32.totalorder %s28_s24, %s28_s24 }
  0x1b   :  { %p225_p11 = scmp.ne.s32.totalorder %s28_s24, %s224_s4  ;;  %p230_p13 = scmp.lt.s32.totalorder %s224_s4, %s224_s4 }
  0x1d   :  { %p231_p0 = por %p230_p13, %p229_p12 }
  0x1f   :  { %p232_p1 = pnand %p231_p0, %p225_p11 }
  0x21   :  { %235 = shalt.err (!%p232_p1)
}
  0x22   :  { %s268_s0 = smov 128   ;;  %s269_s5 = smov 8  }
  0x23   :  { %33 = dma.hbm_to_vmem [thread:$0]  %s329_s1, 512, %s28_s24, [#allocation6], %s268_s0, %s268_s0, %s269_s5  }
  0x24   :  { %258 = dma.done.wait [#allocation3], 512  }
  0x25   :  { %259 = vsyncadd [#allocation3], 4294966784 }
  0x26   :  { %260 = dma.done.wait [#allocation6], 512  }
  0x27   :  { %261 = vsyncadd [#allocation6], 4294966784  ;;  %v188_v0 = vld [vmem:[#allocation2] sm:$0xff]   ;;  %v189_v1 = vld [vmem:[#allocation2 + $0x8] sm:$0xff]   ;;  %vm79_vm0 = vcmask 523264   ;;  %s270_s1 = smov [#allocation7]  }
  0x28   :  { %169 = vmatprep.subr.bf16.mxu0 %v188_v0  ;;  %v190_v2 = vld [vmem:[#allocation2 + $0x10] sm:$0xff]   ;;  %v41_v3 = vld [vmem:[#allocation5] sm:$0xff]  ;;  %v42_v4 = vld [vmem:[#allocation5 + $0x8] sm:$0xff]  ;;  %s144_s8 = sshll.u32 %s270_s1, 4  ;;  %s145_s8 = int_to_ptr.vmem [resolvable:$true] %s144_s8 }
  0x29   :  { %170 = vmatpush3.bf16.msra.mxu0 %v188_v0  ;;  %v45_v5 = vpack.c.bf16 %v42_v4, %v41_v3  ;;  %v191_v6 = vld [vmem:[#allocation2 + $0x18] sm:$0xff]   ;;  %v43_v7 = vld [vmem:[#allocation5 + $0x10] sm:$0xff]  ;;  %s236_s9 = scalar_lea.vmem %s145_s8, 512  ;;  %p241_p3 = scmp.lt.s32.totalorder %s145_s8, %s145_s8 }
  0x2a   :  { %171 = vmatprep.subr.bf16.mxu0 %v189_v1  ;;  %v44_v8 = vld [vmem:[#allocation5 + $0x18] sm:$0xff]  ;;  %p237_p2 = scmp.ne.s32.totalorder %s145_s8, %s236_s9  ;;  %p242_p4 = scmp.lt.s32.totalorder %s236_s9, %s236_s9 }
  0x2b   :  { %177 = vmatprep.mubr.msk.bf16.mxu0 %vm79_vm0, %v45_v5  ;;  %v46_v9 = vpack.c.bf16 %v44_v8, %v43_v7 }
  0x2c   :  { %p243_p5 = por %p242_p4, %p241_p3 }
  0x2d   :  { %172 = vmatpush3.bf16.msra.mxu0 %v189_v1 }
  0x2e   :  { %173 = vmatprep.subr.bf16.mxu0 %v190_v2  ;;  %p244_p6 = pnand %p243_p5, %p237_p2 }
  0x31   :  { %174 = vmatpush3.bf16.msra.mxu0 %v190_v2 }
  0x32   :  { %175 = vmatprep.subr.bf16.mxu0 %v191_v6 }
  0x35   :  { %176 = vmatpush3.bf16.msra.mxu0 %v191_v6 }
  0x38   :  { %178 = vmatmul.mubr.msk.bf16.vlgmr.msra.gmra.mrb[0].mxu0 %vm79_vm0, %v46_v9 }
 0x10b   :  { %v179_v10 = vpop.f32.mrb[0].mxu0 }
 0x10c   :  { %137 = vst [vmem:[#allocation7 + $0x10] sm:$0xff] %v179_v10  ;;  %v120_v11 = vpop.f32.mrb[1].mxu0 }
 0x10d   :  { %135 = vst [vmem:[#allocation7] sm:$0xff] %v120_v11  ;;  %v180_v12 = vpop.f32.mrb[2].mxu0 }
 0x10e   :  { %138 = vst [vmem:[#allocation7 + $0x18] sm:$0xff] %v180_v12  ;;  %v123_v13 = vpop.f32.mrb[3].mxu0 }
 0x10f   :  { %136 = vst [vmem:[#allocation7 + $0x8] sm:$0xff] %v123_v13 }
 0x110   :  { %247 = shalt.err (!%p244_p6)
}
 0x111   :  { %s248_s12 = scalar_lea.hbm %s330_s2, 512 }
 0x112   :  { %p249_p7 = scmp.ne.s32.totalorder %s330_s2, %s248_s12  ;;  %p252_p8 = scmp.lt.u32.totalorder %s248_s12, %s330_s2 }
 0x114   :  { %p254_p9 = pnand %p252_p8, %p249_p7 }
 0x116   :  { %257 = shalt.err (!%p254_p9)
}
 0x117   :  { %150 = dma.vmem_to_hbm [thread:$0]  %s145_s8, 512, %s330_s2, [#allocation4], %s268_s0, %s268_s0, %s269_s5  }
 0x118   :  { %262 = dma.done.wait [#allocation4], 512  }
 0x119   :  { %263 = vsyncadd [#allocation4], 4294966784 }
 0x11a   :  { %154 = vsyncpa [#allocation3], 1 }
 0x11b   :  { %155 = vsyncpa [#allocation6], 1 }
 0x11c   :  { %156 = vsyncpa [#allocation4], 1 }

</bundles_post_ra>
